<compile_context>
chip_gen: v6e
topology: v6e:2x2x1
jax: 0.10.0
libtpu: 0.0.40
codegen_flags: <defaults>
</compile_context>

<pallas_src>
from functools import partial

import jax
import jax.numpy as jnp
from jax.experimental import pallas as pl
from jax.experimental.pallas import tpu as pltpu


def _round_up(x, m):
    return ((x + m - 1) // m) * m


def cnn_text_fused_kernel(emb_ref, wstack_ref, convb_ref, fcw_ref, fcb_ref,
                          out_ref, *, kernel_h, C):
    """Fused conv(3 branches) + ReLU + max-pool + FC.

    emb_ref:    (Bblk, L, D)            float32
    wstack_ref: (D, sum(K)*C)           stacked conv weights, tap-major
    convb_ref:  (1, len(kernel_h)*C)    concatenated conv biases
    fcw_ref:    (len(kernel_h)*C, Npad) FC weight, zero-padded columns
    fcb_ref:    (1, Npad)               FC bias, zero-padded
    out_ref:    (Bblk, Npad)            padded logits (lane-dense)
    """
    Bblk, L, D = emb_ref.shape

    # --- one wide MXU matmul covering every tap of every branch -------------
    emb2d = emb_ref[...].reshape(Bblk * L, D)                    # cheap merge of leading dims
    y = jnp.dot(emb2d, wstack_ref[...],
                preferred_element_type=jnp.float32)              # (Bblk*L, sum(K)*C)
    y = y.reshape(Bblk, L, -1)

    # --- per-branch: shift-add the tap column blocks, then max over time ----
    pooled_parts = []
    tap = 0
    for K in kernel_h:                                           # static unroll
        L_out = L - K + 1
        acc = y[:, 0:L_out, tap * C:(tap + 1) * C]               # (Bblk, L_out, C)
        for k in range(1, K):
            acc = acc + y[:, k:k + L_out, (tap + k) * C:(tap + k + 1) * C]
        pooled_parts.append(jnp.max(acc, axis=1))                # (Bblk, C)
        tap += K

    pooled = jnp.concatenate(pooled_parts, axis=1)               # (Bblk, 3*C)
    # bias + ReLU after the pool (equivalent to relu(conv+b) then max-pool)
    pooled = jnp.maximum(pooled + convb_ref[...], 0.0)

    # --- fused FC layer, lane-dense padded output ----------------------------
    out_ref[...] = (jnp.dot(pooled, fcw_ref[...],
                            preferred_element_type=jnp.float32)
                    + fcb_ref[...])


def cnn_text_forward(token_ids, params, *, block_b=None):
    kernel_h = [w.shape[0] for w in params["conv_w"]]
    C = params["conv_w"][0].shape[2]
    D = params["embedding"].shape[1]
    num_classes = params["fc_w"].shape[1]

    # Embedding lookup (gather) is glue -> plain JAX.
    emb = jnp.take(params["embedding"], token_ids, axis=0).astype(jnp.float32)  # (B, L, D)
    B, L, _ = emb.shape

    # Stack every conv tap of every branch along the output axis:
    # column block [t*C:(t+1)*C] of W_stacked is tap k of branch br.
    w_stacked = jnp.concatenate(
        [jnp.transpose(w, (1, 0, 2)).reshape(D, w.shape[0] * C)
         for w in params["conv_w"]], axis=1)                     # (D, sum(K)*C)
    conv_b = jnp.concatenate(
        [b.reshape(1, C) for b in params["conv_b"]], axis=1)     # (1, 3*C)

    # Lane-dense logits: pad the class dim up to a multiple of 128 with zero
    # FC columns; slice the real classes back out in the wrapper.
    n_pad = _round_up(max(num_classes, 128), 128)
    fc_in = conv_b.shape[1]
    fc_w_pad = jnp.zeros((fc_in, n_pad), jnp.float32).at[:, :num_classes].set(
        params["fc_w"].astype(jnp.float32))
    fc_b_pad = jnp.zeros((1, n_pad), jnp.float32).at[:, :num_classes].set(
        params["fc_b"].reshape(1, -1).astype(jnp.float32))

    # Batch tiling: grid=(1,) at toy sizes; "parallel" axis shards across
    # TensorCores and keeps the per-block VMEM footprint bounded at scale.
    if block_b is None:
        block_b = B if B <= 256 else 128
    grid_b = pl.cdiv(B, block_b)
    b_pad = grid_b * block_b
    if b_pad != B:
        emb = jnp.pad(emb, ((0, b_pad - B), (0, 0), (0, 0)))

    out = pl.pallas_call(
        partial(cnn_text_fused_kernel, kernel_h=tuple(kernel_h), C=C),
        out_shape=jax.ShapeDtypeStruct((b_pad, n_pad), jnp.float32),
        grid=(grid_b,),
        in_specs=[
            pl.BlockSpec((block_b, L, D), lambda i: (i, 0, 0)),
            pl.BlockSpec(w_stacked.shape, lambda i: (0, 0)),
            pl.BlockSpec(conv_b.shape, lambda i: (0, 0)),
            pl.BlockSpec(fc_w_pad.shape, lambda i: (0, 0)),
            pl.BlockSpec(fc_b_pad.shape, lambda i: (0, 0)),
        ],
        out_specs=pl.BlockSpec((block_b, n_pad), lambda i: (i, 0)),
        compiler_params=pltpu.CompilerParams(
            dimension_semantics=("parallel",)),
    )(emb, w_stacked, conv_b, fc_w_pad, fc_b_pad)

    return out[:B, :num_classes]


def cnn_text_reference(token_ids, params):
    """Pure-JAX reference with the original PyTorch op ordering."""
    emb = jnp.take(params["embedding"], token_ids, axis=0)
    feats = []
    for w, b in zip(params["conv_w"], params["conv_b"]):
        K, _, C = w.shape
        L = emb.shape[1]
        L_out = L - K + 1
        acc = jnp.zeros((emb.shape[0], L_out, C), jnp.float32)
        for k in range(K):
            acc = acc + jnp.einsum("bld,dc->blc", emb[:, k:k + L_out, :], w[k])
        acc = jnp.maximum(acc + b[None, :, :], 0.0)    # relu(conv + bias)
        feats.append(jnp.max(acc, axis=1))             # max-pool over time
    feat = jnp.concatenate(feats, axis=1)
    return feat @ params["fc_w"] + params["fc_b"]


def init_params(key, kernel_h, kernel_num, embed_num, embed_dim, num_classes):
    keys = jax.random.split(key, 3 + 2 * len(kernel_h))
    params = {}
    # nn.Embedding default: N(0, 1)
    params["embedding"] = jax.random.normal(
        keys[0], (embed_num, embed_dim), jnp.float32)
    conv_w, conv_b = [], []
    for i, K in enumerate(kernel_h):
        fan_in = K * embed_dim
        bound = float(1.0 / (fan_in ** 0.5))
        conv_w.append(jax.random.uniform(
            keys[1 + 2 * i], (K, embed_dim, kernel_num), jnp.float32, -bound, bound))
        conv_b.append(jax.random.uniform(
            keys[2 + 2 * i], (1, kernel_num), jnp.float32, -bound, bound))
    params["conv_w"] = conv_w
    params["conv_b"] = conv_b
    fc_in = len(kernel_h) * kernel_num
    fb = float(1.0 / (fc_in ** 0.5))
    params["fc_w"] = jax.random.uniform(
        keys[-2], (fc_in, num_classes), jnp.float32, -fb, fb)
    params["fc_b"] = jax.random.uniform(
        keys[-1], (1, num_classes), jnp.float32, -fb, fb)
    return params


if __name__ == "__main__":
    # Small shapes consistent with the module's forward.
    kernel_h = [3, 4, 5]
    kernel_num = 32
    embed_num = 100
    embed_dim = 128
    num_classes = 2
    B, L = 2, 16

    key = jax.random.PRNGKey(0)
    k_params, k_x = jax.random.split(key)
    params = init_params(k_params, kernel_h, kernel_num, embed_num,
                         embed_dim, num_classes)
    token_ids = jax.random.randint(k_x, (B, L), 0, embed_num, dtype=jnp.int32)

    logits = cnn_text_forward(token_ids, params)
    jax.block_until_ready(logits)
    assert logits.shape == (B, num_classes)

    ref = cnn_text_reference(token_ids, params)
    assert jnp.allclose(logits, ref, rtol=5e-2, atol=5e-2), (
        f"max abs diff {jnp.max(jnp.abs(logits - ref))}")

    print("KERNEL_OK")
</pallas_src>

<mosaic_0001>
module attributes {stable_mosaic.version = 11 : i64} {
  func.func @cnn_text_fused_kernel(%arg0: i32, %arg1: memref<2x16x128xf32, #tpu.memory_space<vmem>>, %arg2: memref<128x384xf32, #tpu.memory_space<vmem>>, %arg3: memref<1x96xf32, #tpu.memory_space<vmem>>, %arg4: memref<96x128xf32, #tpu.memory_space<vmem>>, %arg5: memref<1x128xf32, #tpu.memory_space<vmem>>, %arg6: memref<2x128xf32, #tpu.memory_space<vmem>>) attributes {dimension_semantics = [#tpu.dimension_semantics<parallel>], iteration_bounds = array<i64: 1>, scalar_prefetch = 0 : i64, scratch_operands = 0 : i64, tpu.core_type = #tpu.core_type<tc>, window_params = [{transform_indices = @transform_0, window_bounds = array<i64: 2, 16, 128>}, {pipeline_mode = #tpu.pipeline_mode<synchronous>, transform_indices = @transform_1, window_bounds = array<i64: 128, 384>}, {pipeline_mode = #tpu.pipeline_mode<synchronous>, transform_indices = @transform_2, window_bounds = array<i64: 1, 96>}, {pipeline_mode = #tpu.pipeline_mode<synchronous>, transform_indices = @transform_3, window_bounds = array<i64: 96, 128>}, {pipeline_mode = #tpu.pipeline_mode<synchronous>, transform_indices = @transform_4, window_bounds = array<i64: 1, 128>}, {transform_indices = @transform_5, window_bounds = array<i64: 2, 128>}]} {
    %c0 = arith.constant 0 : index
    %c0_0 = arith.constant 0 : index
    %c0_1 = arith.constant 0 : index
    %0 = vector.load %arg1[%c0, %c0_0, %c0_1] : memref<2x16x128xf32, #tpu.memory_space<vmem>>, vector<2x16x128xf32>
    %1 = vector.shape_cast %0 : vector<2x16x128xf32> to vector<32x128xf32>
    %c0_2 = arith.constant 0 : index
    %c0_3 = arith.constant 0 : index
    %2 = vector.load %arg2[%c0_2, %c0_3] : memref<128x384xf32, #tpu.memory_space<vmem>>, vector<128x384xf32>
    %cst = arith.constant dense<0.000000e+00> : vector<32x384xf32>
    %3 = tpu.matmul %1, %2, %cst {dimension_numbers = #tpu.dot_dimension_numbers<[1], [0], [0], [1], [0, 0, 1, 1], [], []>} : vector<32x128xf32>, vector<128x384xf32>, vector<32x384xf32> -> vector<32x384xf32>
    %4 = vector.shape_cast %3 : vector<32x384xf32> to vector<2x16x384xf32>
    %5 = vector.extract_strided_slice %4 {offsets = [0, 0, 0], sizes = [2, 14, 32], strides = [1, 1, 1]} : vector<2x16x384xf32> to vector<2x14x32xf32>
    %6 = vector.extract_strided_slice %4 {offsets = [0, 1, 32], sizes = [2, 14, 32], strides = [1, 1, 1]} : vector<2x16x384xf32> to vector<2x14x32xf32>
    %7 = arith.addf %5, %6 : vector<2x14x32xf32>
    %8 = vector.extract_strided_slice %4 {offsets = [0, 2, 64], sizes = [2, 14, 32], strides = [1, 1, 1]} : vector<2x16x384xf32> to vector<2x14x32xf32>
    %9 = arith.addf %7, %8 : vector<2x14x32xf32>
    %cst_4 = arith.constant dense<0xFF800000> : vector<2x32xf32>
    %10 = vector.multi_reduction <maximumf>, %9, %cst_4 [1] : vector<2x14x32xf32> to vector<2x32xf32>
    %11 = vector.extract_strided_slice %4 {offsets = [0, 0, 96], sizes = [2, 13, 32], strides = [1, 1, 1]} : vector<2x16x384xf32> to vector<2x13x32xf32>
    %12 = vector.extract_strided_slice %4 {offsets = [0, 1, 128], sizes = [2, 13, 32], strides = [1, 1, 1]} : vector<2x16x384xf32> to vector<2x13x32xf32>
    %13 = arith.addf %11, %12 : vector<2x13x32xf32>
    %14 = vector.extract_strided_slice %4 {offsets = [0, 2, 160], sizes = [2, 13, 32], strides = [1, 1, 1]} : vector<2x16x384xf32> to vector<2x13x32xf32>
    %15 = arith.addf %13, %14 : vector<2x13x32xf32>
    %16 = vector.extract_strided_slice %4 {offsets = [0, 3, 192], sizes = [2, 13, 32], strides = [1, 1, 1]} : vector<2x16x384xf32> to vector<2x13x32xf32>
    %17 = arith.addf %15, %16 : vector<2x13x32xf32>
    %cst_5 = arith.constant dense<0xFF800000> : vector<2x32xf32>
    %18 = vector.multi_reduction <maximumf>, %17, %cst_5 [1] : vector<2x13x32xf32> to vector<2x32xf32>
    %19 = vector.extract_strided_slice %4 {offsets = [0, 0, 224], sizes = [2, 12, 32], strides = [1, 1, 1]} : vector<2x16x384xf32> to vector<2x12x32xf32>
    %20 = vector.extract_strided_slice %4 {offsets = [0, 1, 256], sizes = [2, 12, 32], strides = [1, 1, 1]} : vector<2x16x384xf32> to vector<2x12x32xf32>
    %21 = arith.addf %19, %20 : vector<2x12x32xf32>
    %22 = vector.extract_strided_slice %4 {offsets = [0, 2, 288], sizes = [2, 12, 32], strides = [1, 1, 1]} : vector<2x16x384xf32> to vector<2x12x32xf32>
    %23 = arith.addf %21, %22 : vector<2x12x32xf32>
    %24 = vector.extract_strided_slice %4 {offsets = [0, 3, 320], sizes = [2, 12, 32], strides = [1, 1, 1]} : vector<2x16x384xf32> to vector<2x12x32xf32>
    %25 = arith.addf %23, %24 : vector<2x12x32xf32>
    %26 = vector.extract_strided_slice %4 {offsets = [0, 4, 352], sizes = [2, 12, 32], strides = [1, 1, 1]} : vector<2x16x384xf32> to vector<2x12x32xf32>
    %27 = arith.addf %25, %26 : vector<2x12x32xf32>
    %cst_6 = arith.constant dense<0xFF800000> : vector<2x32xf32>
    %28 = vector.multi_reduction <maximumf>, %27, %cst_6 [1] : vector<2x12x32xf32> to vector<2x32xf32>
    %29 = tpu.concatenate %10, %18, %28 in 1 : vector<2x32xf32>, vector<2x32xf32>, vector<2x32xf32> -> vector<2x96xf32>
    %c0_7 = arith.constant 0 : index
    %c0_8 = arith.constant 0 : index
    %30 = vector.load %arg3[%c0_7, %c0_8] : memref<1x96xf32, #tpu.memory_space<vmem>>, vector<1x96xf32>
    %31 = vector.broadcast %30 : vector<1x96xf32> to vector<2x96xf32>
    %32 = arith.addf %29, %31 : vector<2x96xf32>
    %cst_9 = arith.constant 0.000000e+00 : f32
    %33 = vector.broadcast %cst_9 : f32 to vector<2x96xf32>
    %34 = arith.maximumf %32, %33 : vector<2x96xf32>
    %c0_10 = arith.constant 0 : index
    %c0_11 = arith.constant 0 : index
    %35 = vector.load %arg4[%c0_10, %c0_11] : memref<96x128xf32, #tpu.memory_space<vmem>>, vector<96x128xf32>
    %cst_12 = arith.constant dense<0.000000e+00> : vector<2x128xf32>
    %36 = tpu.matmul %34, %35, %cst_12 {dimension_numbers = #tpu.dot_dimension_numbers<[1], [0], [0], [1], [0, 0, 1, 1], [], []>} : vector<2x96xf32>, vector<96x128xf32>, vector<2x128xf32> -> vector<2x128xf32>
    %c0_13 = arith.constant 0 : index
    %c0_14 = arith.constant 0 : index
    %37 = vector.load %arg5[%c0_13, %c0_14] : memref<1x128xf32, #tpu.memory_space<vmem>>, vector<1x128xf32>
    %38 = vector.broadcast %37 : vector<1x128xf32> to vector<2x128xf32>
    %39 = arith.addf %36, %38 : vector<2x128xf32>
    %c0_15 = arith.constant 0 : index
    %c0_16 = arith.constant 0 : index
    %40 = vector.load %arg6[%c0_15, %c0_16] : memref<2x128xf32, #tpu.memory_space<vmem>>, vector<2x128xf32>
    tpu.vector_store %arg6[%c0_15, %c0_16], %39 {strides = array<i32>} : memref<2x128xf32, #tpu.memory_space<vmem>>, vector<2x128xf32>,
    return
  }
  func.func @transform_0(%arg0: i32) -> (i32, i32, i32) {
    %c0_i32 = arith.constant 0 : i32
    %c0_i32_0 = arith.constant 0 : i32
    %c0_i32_1 = arith.constant 0 : i32
    return %arg0, %c0_i32, %c0_i32_0 : i32, i32, i32
  }
  func.func @transform_1(%arg0: i32) -> (i32, i32) {
    %c0_i32 = arith.constant 0 : i32
    %c0_i32_0 = arith.constant 0 : i32
    %c0_i32_1 = arith.constant 0 : i32
    return %c0_i32, %c0_i32_0 : i32, i32
  }
  func.func @transform_2(%arg0: i32) -> (i32, i32) {
    %c0_i32 = arith.constant 0 : i32
    %c0_i32_0 = arith.constant 0 : i32
    %c0_i32_1 = arith.constant 0 : i32
    return %c0_i32, %c0_i32_0 : i32, i32
  }
  func.func @transform_3(%arg0: i32) -> (i32, i32) {
    %c0_i32 = arith.constant 0 : i32
    %c0_i32_0 = arith.constant 0 : i32
    %c0_i32_1 = arith.constant 0 : i32
    return %c0_i32, %c0_i32_0 : i32, i32
  }
  func.func @transform_4(%arg0: i32) -> (i32, i32) {
    %c0_i32 = arith.constant 0 : i32
    %c0_i32_0 = arith.constant 0 : i32
    %c0_i32_1 = arith.constant 0 : i32
    return %c0_i32, %c0_i32_0 : i32, i32
  }
  func.func @transform_5(%arg0: i32) -> (i32, i32) {
    %c0_i32 = arith.constant 0 : i32
    %c0_i32_0 = arith.constant 0 : i32
    return %arg0, %c0_i32 : i32, i32
  }
}

</mosaic_0001>

<bundles_post_ra>
// kernel: tpu_custom_call.1
= control target key start
LH: loop header
LB: loop body
LE: loop exit
PB: predicated region body
PF: predicated region fallthrough
CT: control target
= control target key end

     0   :  { %10 = vsyncpa [#allocation3], 0  ;;  %s1108_s0 = inlined_call_operand.hbm [shape: f32[2,16,128], index: 0, kind: input, shape index: {}]   ;;  %s1109_s1 = inlined_call_operand.hbm [shape: f32[128,384], index: 1, kind: input, shape index: {}]   ;;  %s1110_s2 = inlined_call_operand.vmem [shape: f32[1,96], index: 2, kind: input, shape index: {}]   ;;  %s1111_s3 = inlined_call_operand.hbm [shape: f32[96,128], index: 3, kind: input, shape index: {}]   ;;  %s1112_s4 = inlined_call_operand.vmem [shape: f32[1,128], index: 4, kind: input, shape index: {}]   ;;  %s1113_s5 = inlined_call_operand.hbm [shape: f32[2,128], index: 5, kind: output, shape index: {}]  }
   0x1   :  { %11 = vsyncpa [#allocation6], 0 }
   0x2   :  { %12 = vsyncpa [#allocation4], 0  ;;  %s892_s18 = smov [#allocation5]  }
   0x3   :  { %s30_s19 = sshll.u32 %s892_s18, 4  ;;  %s31_s19 = int_to_ptr.vmem [resolvable:$true] %s30_s19 }
   0x4   :  { %s814_s20 = scalar_lea.vmem %s31_s19, 6144  ;;  %p819_p1 = scmp.lt.s32.totalorder %s31_s19, %s31_s19 }
   0x5   :  { %p815_p0 = scmp.ne.s32.totalorder %s31_s19, %s814_s20  ;;  %p820_p2 = scmp.lt.s32.totalorder %s814_s20, %s814_s20 }
   0x7   :  { %p821_p3 = por %p820_p2, %p819_p1 }
   0x9   :  { %p822_p4 = pnand %p821_p3, %p815_p0 }
   0xb   :  { %825 = shalt.err (!%p822_p4)
}
   0xc   :  { %s893_s21 = smov 384   ;;  %s894_s22 = smov 24  }
   0xd   :  { %36 = dma.hbm_to_vmem [thread:$0]  %s1109_s1, 6144, %s31_s19, [#allocation6], %s893_s21, %s893_s21, %s894_s22  }
   0xe   :  { %s895_s25 = smov [#allocation2]  }
   0xf   :  { %s18_s26 = sshll.u32 %s895_s25, 4  ;;  %s19_s26 = int_to_ptr.vmem [resolvable:$true] %s18_s26 }
  0x10   :  { %s834_s27 = scalar_lea.vmem %s19_s26, 512  ;;  %p839_p6 = scmp.lt.s32.totalorder %s19_s26, %s19_s26 }
  0x11   :  { %p835_p5 = scmp.ne.s32.totalorder %s19_s26, %s834_s27  ;;  %p840_p7 = scmp.lt.s32.totalorder %s834_s27, %s834_s27 }
  0x13   :  { %p841_p8 = por %p840_p7, %p839_p6 }
  0x15   :  { %p842_p9 = pnand %p841_p8, %p835_p5 }
  0x17   :  { %845 = shalt.err (!%p842_p9)
}
  0x18   :  { %s896_s28 = smov 128   ;;  %s897_s29 = smov 8  }
  0x19   :  { %24 = dma.hbm_to_vmem [thread:$0]  %s1108_s0, 512, %s19_s26, [#allocation3], %s896_s28, %s896_s28, %s897_s29  }
  0x1a   :  { %s898_s7 = smov [#allocation7]  }
  0x1b   :  { %s44_s8 = sshll.u32 %s898_s7, 4  ;;  %s45_s8 = int_to_ptr.vmem [resolvable:$true] %s44_s8 }
  0x1c   :  { %s854_s1 = scalar_lea.vmem %s45_s8, 1536  ;;  %p859_p11 = scmp.lt.s32.totalorder %s45_s8, %s45_s8 }
  0x1d   :  { %p855_p10 = scmp.ne.s32.totalorder %s45_s8, %s854_s1  ;;  %p860_p12 = scmp.lt.s32.totalorder %s854_s1, %s854_s1 }
  0x1f   :  { %p861_p13 = por %p860_p12, %p859_p11 }
  0x21   :  { %p862_p0 = pnand %p861_p13, %p855_p10 }
  0x23   :  { %865 = shalt.err (!%p862_p0)
}
  0x24   :  { %50 = dma.hbm_to_vmem [thread:$0]  %s1111_s3, 1536, %s45_s8, [#allocation6], %s896_s28, %s896_s28, %s897_s29  }
  0x25   :  { %886 = dma.done.wait [#allocation3], 512  }
  0x26   :  { %887 = vsyncadd [#allocation3], 4294966784 }
  0x27   :  { %888 = dma.done.wait [#allocation6], 7680  }
  0x28   :  { %889 = vsyncadd [#allocation6], 4294959616  ;;  %v899_v0 = vmov 0.0   ;;  %v113_v1 = vld [vmem:[#allocation5 + $0x178] sm:$0xff]  ;;  %v110_v2 = vld [vmem:[#allocation5 + $0x160] sm:$0xff]  ;;  %vm292_vm0 = vcmask 1046528  }
  0x29   :  { %178 = vmatprep.mubr.f32.mxu0 %v899_v0  ;;  %v112_v3 = vld [vmem:[#allocation5 + $0x170] sm:$0xff]  ;;  %728 = vmatprep.subr.mxu1 %v113_v1  ;;  %v111_v4 = vld [vmem:[#allocation5 + $0x168] sm:$0xff]  ;;  %v109_v5 = vld [vmem:[#allocation5 + $0x158] sm:$0xff]  ;;  %s900_s0 = smov 64   ;;  %s901_s3 = smov 96   ;;  %vm315_vm1 = vcmask 1045504  }
  0x2a   :  { %114 = vmatprep.subr.mxu0 %v112_v3  ;;  %729 = vmatpush3.msra.mxu1 %v113_v1  ;;  %v107_v6 = vld [vmem:[#allocation5 + $0x148] sm:$0xff]  ;;  %v108_v7 = vld [vmem:[#allocation5 + $0x150] sm:$0xff]  ;;  %v106_v8 = vld [vmem:[#allocation5 + $0x140] sm:$0xff]  ;;  %s902_s11 = smov 32   ;;  %vm519_vm2 = vcmask 1043456   ;;  %vm406_vm3 = vcmask 1044480  }
  0x2b   :  { %115 = vmatpush1.msra.mxu0 %v111_v4  ;;  %730 = vmatprep.subr.mxu1 %v110_v2  ;;  %v105_v9 = vld [vmem:[#allocation5 + $0x138] sm:$0xff]  ;;  %v104_v10 = vld [vmem:[#allocation5 + $0x130] sm:$0xff]  ;;  %v103_v11 = vld [vmem:[#allocation5 + $0x128] sm:$0xff]  ;;  %vm535_vm4 = vcmask 1044224   ;;  %vm429_vm5 = vcmask 1048320   ;;  %vm431_vm6 = vcmask 1045248  }
  0x2c   :  { %116 = vmatprep.subr.mxu0 %v109_v5  ;;  %731 = vmatpush3.msra.mxu1 %v110_v2  ;;  %v102_v12 = vld [vmem:[#allocation5 + $0x120] sm:$0xff]  ;;  %v101_v13 = vld [vmem:[#allocation5 + $0x118] sm:$0xff]  ;;  %v100_v14 = vld [vmem:[#allocation5 + $0x110] sm:$0xff]  ;;  %vm555_vm7 = vcmask 1041409   ;;  %vm903_vm8 = vmmov 0   ;;  %vm340_vm9 = vcmask 259072  }
  0x2d   :  { %117 = vmatpush1.msra.mxu0 %v108_v7  ;;  %732 = vmatprep.subr.mxu1 %v107_v6  ;;  %v99_v15 = vld [vmem:[#allocation5 + $0x108] sm:$0xff]  ;;  %v98_v16 = vld [vmem:[#allocation5 + $0x100] sm:$0xff]  ;;  %v97_v17 = vld [vmem:[#allocation5 + $0xf8] sm:$0xff]  ;;  %vm338_vm10 = vcmask 261120   ;;  %vm571_vm11 = vcmask 523264   ;;  %vm601_vm12 = vcmask 785408  }
  0x2e   :  { %118 = vmatprep.subr.mxu0 %v106_v8  ;;  %733 = vmatpush3.msra.mxu1 %v107_v6  ;;  %v96_v18 = vld [vmem:[#allocation5 + $0xf0] sm:$0xff]  ;;  %v95_v19 = vld [vmem:[#allocation5 + $0xe8] sm:$0xff]  ;;  %v94_v20 = vld [vmem:[#allocation5 + $0xe0] sm:$0xff]  ;;  %s904_s16 = smov [#allocation8]  }
  0x2f   :  { %119 = vmatpush1.msra.mxu0 %v105_v9  ;;  %734 = vmatprep.subr.mxu1 %v104_v10  ;;  %v93_v21 = vld [vmem:[#allocation5 + $0xd8] sm:$0xff]  ;;  %v92_v22 = vld [vmem:[#allocation5 + $0xd0] sm:$0xff]  ;;  %v91_v23 = vld [vmem:[#allocation5 + $0xc8] sm:$0xff]  ;;  %s682_s17 = sshll.u32 %s904_s16, 4  ;;  %s683_s17 = int_to_ptr.vmem [resolvable:$true] %s682_s17 }
  0x30   :  { %120 = vmatprep.subr.mxu0 %v103_v11  ;;  %735 = vmatpush3.msra.mxu1 %v104_v10  ;;  %v90_v24 = vld [vmem:[#allocation5 + $0xc0] sm:$0xff]  ;;  %v89_v25 = vld [vmem:[#allocation5 + $0xb8] sm:$0xff]  ;;  %v88_v26 = vld [vmem:[#allocation5 + $0xb0] sm:$0xff]  ;;  %p871_p2 = scmp.lt.s32.totalorder %s683_s17, %s683_s17 }
  0x31   :  { %121 = vmatpush1.msra.mxu0 %v102_v12  ;;  %736 = vmatprep.subr.mxu1 %v101_v13  ;;  %v87_v27 = vld [vmem:[#allocation5 + $0xa8] sm:$0xff]  ;;  %v86_v28 = vld [vmem:[#allocation5 + $0xa0] sm:$0xff]  ;;  %v85_v29 = vld [vmem:[#allocation5 + $0x98] sm:$0xff] }
  0x32   :  { %122 = vmatprep.subr.mxu0 %v100_v14  ;;  %737 = vmatpush3.msra.mxu1 %v101_v13  ;;  %v84_v30 = vld [vmem:[#allocation5 + $0x90] sm:$0xff]  ;;  %v83_v31 = vld [vmem:[#allocation5 + $0x88] sm:$0xff]  ;;  %v82_v32 = vld [vmem:[#allocation5 + $0x80] sm:$0xff] }
  0x33   :  { %123 = vmatpush1.msra.mxu0 %v99_v15  ;;  %738 = vmatprep.subr.mxu1 %v98_v16  ;;  %v81_v33 = vld [vmem:[#allocation5 + $0x78] sm:$0xff]  ;;  %v80_v34 = vld [vmem:[#allocation5 + $0x70] sm:$0xff]  ;;  %v79_v35 = vld [vmem:[#allocation5 + $0x68] sm:$0xff] }
  0x34   :  { %124 = vmatprep.subr.mxu0 %v97_v17  ;;  %739 = vmatpush3.msra.mxu1 %v98_v16  ;;  %v78_v36 = vld [vmem:[#allocation5 + $0x60] sm:$0xff]  ;;  %v77_v37 = vld [vmem:[#allocation5 + $0x58] sm:$0xff]  ;;  %v76_v38 = vld [vmem:[#allocation5 + $0x50] sm:$0xff] }
  0x35   :  { %125 = vmatpush1.msra.mxu0 %v96_v18  ;;  %740 = vmatprep.subr.mxu1 %v95_v19  ;;  %v75_v39 = vld [vmem:[#allocation5 + $0x48] sm:$0xff]  ;;  %v74_v40 = vld [vmem:[#allocation5 + $0x40] sm:$0xff]  ;;  %v73_v41 = vld [vmem:[#allocation5 + $0x38] sm:$0xff] }
  0x36   :  { %126 = vmatprep.subr.mxu0 %v94_v20  ;;  %741 = vmatpush3.msra.mxu1 %v95_v19  ;;  %v72_v42 = vld [vmem:[#allocation5 + $0x30] sm:$0xff]  ;;  %v71_v43 = vld [vmem:[#allocation5 + $0x28] sm:$0xff]  ;;  %v70_v44 = vld [vmem:[#allocation5 + $0x20] sm:$0xff] }
  0x37   :  { %127 = vmatpush1.msra.mxu0 %v93_v21  ;;  %742 = vmatprep.subr.mxu1 %v92_v22  ;;  %v62_v45 = vld [vmem:[#allocation2] sm:$0xff]  ;;  %v68_v46 = vld [vmem:[#allocation5 + $0x10] sm:$0xff]  ;;  %v69_v47 = vld [vmem:[#allocation5 + $0x18] sm:$0xff] }
  0x38   :  { %128 = vmatprep.subr.mxu0 %v91_v23  ;;  %743 = vmatpush3.msra.mxu1 %v92_v22  ;;  %v67_v48 = vld [vmem:[#allocation5 + $0x8] sm:$0xff]  ;;  %v66_v50 = vld [vmem:[#allocation5] sm:$0xff]  ;;  %v64_v51 = vld [vmem:[#allocation2 + $0x10] sm:$0xff] }
  0x39   :  { %129 = vmatpush1.msra.mxu0 %v90_v24  ;;  %744 = vmatprep.subr.mxu1 %v89_v25  ;;  %v63_v49 = vld [vmem:[#allocation2 + $0x8] sm:$0xff]  ;;  %v65_v52 = vld [vmem:[#allocation2 + $0x18] sm:$0xff] }
  0x3a   :  { %130 = vmatprep.subr.mxu0 %v88_v26  ;;  %745 = vmatpush3.msra.mxu1 %v89_v25 }
  0x3b   :  { %131 = vmatpush1.msra.mxu0 %v87_v27  ;;  %746 = vmatprep.subr.mxu1 %v86_v28 }
  0x3c   :  { %132 = vmatprep.subr.mxu0 %v85_v29  ;;  %747 = vmatpush3.msra.mxu1 %v86_v28 }
  0x3d   :  { %133 = vmatpush1.msra.mxu0 %v84_v30  ;;  %748 = vmatprep.subr.mxu1 %v83_v31 }
  0x3e   :  { %134 = vmatprep.subr.mxu0 %v82_v32  ;;  %749 = vmatpush3.msra.mxu1 %v83_v31 }
  0x3f   :  { %135 = vmatpush1.msra.mxu0 %v81_v33  ;;  %750 = vmatprep.subr.mxu1 %v80_v34 }
  0x40   :  { %136 = vmatprep.subr.mxu0 %v79_v35  ;;  %751 = vmatpush3.msra.mxu1 %v80_v34 }
  0x41   :  { %137 = vmatpush1.msra.mxu0 %v78_v36  ;;  %752 = vmatprep.subr.mxu1 %v77_v37 }
  0x42   :  { %138 = vmatprep.subr.mxu0 %v76_v38  ;;  %753 = vmatpush3.msra.mxu1 %v77_v37 }
  0x43   :  { %139 = vmatpush1.msra.mxu0 %v75_v39  ;;  %754 = vmatprep.subr.mxu1 %v74_v40 }
  0x44   :  { %140 = vmatprep.subr.mxu0 %v73_v41  ;;  %755 = vmatpush3.msra.mxu1 %v74_v40 }
  0x45   :  { %141 = vmatpush1.msra.mxu0 %v72_v42  ;;  %756 = vmatprep.subr.mxu1 %v71_v43 }
  0x46   :  { %142 = vmatprep.subr.mxu0 %v70_v44  ;;  %757 = vmatpush3.msra.mxu1 %v71_v43 }
  0x47   :  { %760 = vmatprep.mubr.f32.mxu1 %v62_v45  ;;  %758 = vmatprep.subr.mxu1 %v68_v46 }
  0x48   :  { %143 = vmatpush1.msra.mxu0 %v69_v47  ;;  %759 = vmatpush3.msra.mxu1 %v68_v46 }
  0x49   :  { %144 = vmatprep.subr.mxu0 %v67_v48  ;;  %761 = vmatmul.mubr.f32.vlgmr.msra.gmra.mxu1 %v63_v49 }
  0x4a   :  { %145 = vmatpush1.msra.mxu0 %v66_v50  ;;  %763 = vmatprep.mubr.f32.mxu1 %v64_v51 }
  0x4b   :  { %179 = vmatmul.mubr.f32.vlgmr.msra.gmra.mxu0 %v62_v45  ;;  %766 = vmatprep.subr.mxu0 %v899_v0 }
  0x4c   :  { %184 = vmatprep.mubr.f32.mxu0 %v899_v0 }
  0x4d   :  { %764 = vmatmul.mubr.f32.gmra.mxu1 %v65_v52 }
  0x4f   :  { %185 = vmatmul.mubr.f32.gmra.mxu0 %v63_v49 }
  0x50   :  { %190 = vmatprep.mubr.f32.mxu0 %v899_v0 }
  0x53   :  { %191 = vmatmul.mubr.f32.gmra.mxu0 %v64_v51 }
  0x54   :  { %196 = vmatprep.mubr.f32.mxu0 %v899_v0 }
  0x57   :  { %197 = vmatmul.mubr.f32.gmra.mxu0 %v65_v52 }
  0x58   :  { %790 = vmatprep.mubr.msk.f32.mxu0 %vm903_vm8, %v899_v0 }
 0x109   :  { %v949_v53 = vpop.f32.mrf.mxu1 }
 0x10a   :  { %v476_v54 = vrot.slane %v949_v53, 2  ;;  %v454_v55 = vrot.slane %v949_v53, 1  ;;  %v498_v61 = vrot.slane %v949_v53, 3  ;;  %v521_v6 = vrot.slane %v949_v53, 4 }
 0x10b   :  { %v953_v56 = vpop.f32.mrf.mxu0  ;;  %v269_v57 = vpop.f32.mrf.mxu1 }
 0x10c   :  { %v453_v58 = vrot.slane %v269_v57, 1  ;;  %483 = vrot.lane.b32.xlu1 %v476_v54, %s900_s0  ;;  %461 = vrot.lane.b32.xlu0 %v454_v55, %s901_s3  ;;  %v475_v63 = vrot.slane %v269_v57, 2  ;;  %v520_v2 = vrot.slane %v269_v57, 4  ;;  %v497_v7 = vrot.slane %v269_v57, 3 }
 0x10d   :  { %v957_v59 = vpop.f32.mrf.mxu0  ;;  %v959_v60 = vpop.f32.mrf.mxu1  ;;  %v293_v43 = vrot.slane %v953_v56, 1  ;;  %v316_v49 = vrot.slane %v953_v56, 2 }
 0x10e   :  { %v455_v62 = vsel %vm292_vm0, %v453_v58, %v454_v55  ;;  %v457_v4 = vrot.slane %v959_v60, 1  ;;  %v477_v8 = vsel %vm315_vm1, %v475_v63, %v476_v54  ;;  %v976_v10 = vsel %vm519_vm2, %v520_v2, %v521_v6  ;;  %v593_v58 = vld [vmem:[#allocation7 + $0x58] sm:$0xff]  ;;  %v590_v63 = vld [vmem:[#allocation7 + $0x40] sm:$0xff]  ;;  %v588_v2 = vld [vmem:[#allocation7 + $0x30] sm:$0xff] }
 0x10f   :  { %v279_v1 = vpop.f32.mrf.mxu1  ;;  %v965_v3 = vpop.f32.mrf.mxu0  ;;  %v524_v11 = vrot.slane %v959_v60, 4  ;;  %v479_v12 = vrot.slane %v959_v60, 2  ;;  %v362_v14 = vrot.slane %v957_v59, 1  ;;  %v499_v16 = vsel %vm406_vm3, %v497_v7, %v498_v61  ;;  %767 = vmatpush3.msra.mxu0 %v593_v58 }
 0x110   :  { %505 = vrot.lane.b32.xlu1 %v498_v61, %s902_s11  ;;  %459 = vrot.lane.b32.xlu0 %v455_v62, %s901_s3  ;;  %v523_v5 = vrot.slane %v279_v1, 4  ;;  %v501_v17 = vrot.slane %v959_v60, 3  ;;  %v478_v18 = vrot.slane %v279_v1, 2  ;;  %v384_v21 = vrot.slane %v957_v59, 2  ;;  %v592_v61 = vld [vmem:[#allocation7 + $0x50] sm:$0xff]  ;;  %v591_v62 = vld [vmem:[#allocation7 + $0x48] sm:$0xff] }
 0x111   :  { %v970_v9 = vpop.f32.mrf.mxu0  ;;  %v500_v25 = vrot.slane %v279_v1, 3  ;;  %v407_v29 = vrot.slane %v957_v59, 3  ;;  %v456_v30 = vrot.slane %v279_v1, 1  ;;  %v294_v45 = vrot.slane %v965_v3, 1  ;;  %768 = vmatprep.subr.mxu0 %v899_v0  ;;  %v589_v1 = vld [vmem:[#allocation7 + $0x38] sm:$0xff] }
 0x112   :  { %v982_v13 = vsel %vm519_vm2, %v523_v5, %v524_v11  ;;  %v363_v15 = vrot.slane %v970_v9, 1  ;;  %v480_v22 = vsel %vm315_vm1, %v478_v18, %v479_v12  ;;  %v385_v23 = vrot.slane %v970_v9, 2  ;;  %769 = vmatpush3.msra.mxu0 %v592_v61 }
 0x113   :  { %v993_v20 = vpop.f32.mrf.mxu0  ;;  %v408_v28 = vrot.slane %v970_v9, 3  ;;  %v502_v31 = vsel %vm406_vm3, %v500_v25, %v501_v17  ;;  %v458_v34 = vsel %vm292_vm0, %v456_v30, %v457_v4  ;;  %v295_v47 = vsel %vm292_vm0, %v293_v43, %v294_v45  ;;  %770 = vmatprep.subr.mxu0 %v899_v0 }
 0x114   :  { %481 = vrot.lane.b32.xlu0 %v477_v8, %s900_s0  ;;  %465 = vrot.lane.b32.xlu1 %v457_v4, %s901_s3  ;;  %v364_v19 = vsel %vm292_vm0, %v362_v14, %v363_v15  ;;  %v386_v26 = vsel %vm315_vm1, %v384_v21, %v385_v23  ;;  %v296_v46 = vrot.slane %v993_v20, 1  ;;  %v317_v51 = vrot.slane %v965_v3, 2 }
 0x115   :  { %v1000_v24 = vpop.f32.mrf.mxu0  ;;  %v409_v35 = vsel %vm406_vm3, %v407_v29, %v408_v28  ;;  %v319_v52 = vrot.slane %v993_v20, 2  ;;  %771 = vmatpush3.msra.mxu0 %v591_v62 }
 0x116   :  { %v365_v33 = vrot.slane %v1000_v24, 1  ;;  %v387_v37 = vrot.slane %v1000_v24, 2  ;;  %v410_v40 = vrot.slane %v1000_v24, 3  ;;  %v318_v54 = vsel %vm315_vm1, %v316_v49, %v317_v51  ;;  %772 = vmatprep.subr.mxu0 %v899_v0 }
 0x117   :  { %v1005_v27 = vpop.f32.mrf.mxu0  ;;  %773 = vmatpush3.msra.mxu0 %v590_v63 }
 0x118   :  { %503 = vrot.lane.b32.xlu0 %v499_v16, %s902_s11  ;;  %487 = vrot.lane.b32.xlu1 %v479_v12, %s900_s0  ;;  %v297_v48 = vrot.slane %v1005_v27, 1  ;;  %v320_v55 = vrot.slane %v1005_v27, 2 }
 0x119   :  { %v1010_v32 = vpop.f32.mrf.mxu0  ;;  %774 = vmatprep.subr.mxu0 %v899_v0 }
 0x11a   :  { %v366_v36 = vrot.slane %v1010_v32, 1  ;;  %v388_v39 = vrot.slane %v1010_v32, 2  ;;  %v411_v42 = vrot.slane %v1010_v32, 3  ;;  %v298_v50 = vsel %vm292_vm0, %v296_v46, %v297_v48  ;;  %775 = vmatpush3.msra.mxu0 %v589_v1 }
 0x11b   :  { %v321_v57 = vsel %vm315_vm1, %v319_v52, %v320_v55  ;;  %776 = vmatprep.subr.mxu0 %v899_v0 }
 0x11c   :  { %509 = vrot.lane.b32.xlu1 %v501_v17, %s902_s11  ;;  %368 = vrot.lane.b32.xlu0 %v364_v19, %s901_s3  ;;  %v367_v38 = vsel %vm292_vm0, %v365_v33, %v366_v36  ;;  %v389_v41 = vsel %vm315_vm1, %v387_v37, %v388_v39  ;;  %v412_v44 = vsel %vm406_vm3, %v410_v40, %v411_v42 }
 0x11d   :  { %777 = vmatpush3.msra.mxu0 %v588_v2 }
 0x11e   :  { %778 = vmatprep.subr.mxu0 %v899_v0 }
 0x120   :  { %370 = vrot.lane.b32.xlu1 %v363_v15, %s901_s3  ;;  %485 = vrot.lane.b32.xlu0 %v480_v22, %s900_s0 }
 0x124   :  { %392 = vrot.lane.b32.xlu1 %v385_v23, %s900_s0  ;;  %390 = vrot.lane.b32.xlu0 %v386_v26, %s900_s0 }
 0x128   :  { %415 = vrot.lane.b32.xlu1 %v408_v28, %s902_s11  ;;  %507 = vrot.lane.b32.xlu0 %v502_v31, %s902_s11 }
 0x12c   :  { %463 = vrot.lane.b32.xlu1 %v458_v34, %s901_s3  ;;  %413 = vrot.lane.b32.xlu0 %v409_v35, %s902_s11 }
 0x130   :  { %374 = vrot.lane.b32.xlu1 %v366_v36, %s901_s3  ;;  %372 = vrot.lane.b32.xlu0 %v367_v38, %s901_s3 }
 0x134   :  { %396 = vrot.lane.b32.xlu1 %v388_v39, %s900_s0  ;;  %394 = vrot.lane.b32.xlu0 %v389_v41, %s900_s0 }
 0x138   :  { %419 = vrot.lane.b32.xlu1 %v411_v42, %s902_s11  ;;  %417 = vrot.lane.b32.xlu0 %v412_v44, %s902_s11 }
 0x13c   :  { %301 = vrot.lane.b32.xlu1 %v294_v45, %s901_s3  ;;  %299 = vrot.lane.b32.xlu0 %v295_v47, %s901_s3 }
 0x140   :  { %305 = vrot.lane.b32.xlu1 %v297_v48, %s901_s3  ;;  %303 = vrot.lane.b32.xlu0 %v298_v50, %s901_s3 }
 0x144   :  { %324 = vrot.lane.b32.xlu1 %v317_v51, %s900_s0  ;;  %322 = vrot.lane.b32.xlu0 %v318_v54, %s900_s0 }
 0x148   :  { %328 = vrot.lane.b32.xlu1 %v320_v55, %s900_s0  ;;  %326 = vrot.lane.b32.xlu0 %v321_v57, %s900_s0 }
 0x17e   :  { %v484_v4 = vpop.permute.xlu1 %483  ;;  %v462_v5 = vpop.permute.xlu0 %461 }
 0x17f   :  { %v472_v7 = vadd.f32 %v462_v5, %v970_v9 }
 0x181   :  { %v494_v14 = vadd.f32 %v484_v4, %v472_v7 }
 0x182   :  { %v506_v8 = vpop.permute.xlu1 %505  ;;  %v460_v12 = vpop.permute.xlu0 %459 }
 0x183   :  { %v516_v17 = vadd.f32 %v506_v8, %v494_v14  ;;  %v471_v18 = vadd.f32 %v460_v12, %v957_v59  ;;  %v586_v12 = vld [vmem:[#allocation7 + $0x20] sm:$0xff] }
 0x185   :  { %v531_v23 = vadd.f32 %v521_v6, %v516_v17 }
 0x186   :  { %v482_v15 = vpop.permute.xlu0 %481  ;;  %v466_v16 = vpop.permute.xlu1 %465 }
 0x187   :  { %v493_v19 = vadd.f32 %v482_v15, %v471_v18  ;;  %v536_v29 = vsel %vm535_vm4, %v531_v23, -inf  ;;  %v474_v37 = vadd.f32 %v466_v16, %v1010_v32 }
 0x18a   :  { %v504_v21 = vpop.permute.xlu0 %503  ;;  %v488_v22 = vpop.permute.xlu1 %487 }
 0x18b   :  { %v515_v25 = vadd.f32 %v504_v21, %v493_v19  ;;  %v496_v39 = vadd.f32 %v488_v22, %v474_v37  ;;  %v585_v19 = vld [vmem:[#allocation7 + $0x18] sm:$0xff]  ;;  %v583_v37 = vld [vmem:[#allocation7 + $0x8] sm:$0xff] }
 0x18d   :  { %v530_v26 = vadd.f32 %v976_v10, %v515_v25 }
 0x18e   :  { %v510_v9 = vpop.permute.xlu1 %509  ;;  %v369_v28 = vpop.permute.xlu0 %368 }
 0x18f   :  { %v534_v30 = vsel %vm429_vm5, %v530_v26, -inf  ;;  %v380_v38 = vadd.f32 %v369_v28, %v953_v56  ;;  %v518_v44 = vadd.f32 %v510_v9, %v496_v39 }
 0x190   :  { %v537_v31 = vmax.f32 %v534_v30, %v536_v29 }
 0x191   :  { %v533_v54 = vadd.f32 %v524_v11, %v518_v44  ;;  %v587_v11 = vld [vmem:[#allocation7 + $0x28] sm:$0xff] }
 0x192   :  { %v371_v33 = vpop.permute.xlu1 %370  ;;  %v486_v59 = vpop.permute.xlu0 %485  ;;  %v538_v47 = vrot.slane %v537_v31, 4  ;;  %779 = vmatpush3.msra.mxu0 %v587_v11 }
 0x193   :  { %v381_v36 = vadd.f32 %v371_v33, %v965_v3  ;;  %v545_v63 = vsel %vm535_vm4, %v533_v54, -inf  ;;  %780 = vmatprep.subr.mxu0 %v899_v0 }
 0x194   :  { %v539_v57 = vmax.f32 %v537_v31, %v538_v47  ;;  %781 = vmatpush3.msra.mxu0 %v586_v12 }
 0x195   :  { %782 = vmatprep.subr.mxu0 %v899_v0 }
 0x196   :  { %v393_v34 = vpop.permute.xlu1 %392  ;;  %v391_v35 = vpop.permute.xlu0 %390  ;;  %v540_v5 = vrot.slane %v539_v57, 2  ;;  %783 = vmatpush3.msra.mxu0 %v585_v19 }
 0x197   :  { %v403_v10 = vadd.f32 %v393_v34, %v381_v36  ;;  %v402_v40 = vadd.f32 %v391_v35, %v380_v38  ;;  %784 = vmatprep.subr.mxu0 %v899_v0 }
 0x198   :  { %v541_v21 = vmax.f32 %v539_v57, %v540_v5 }
 0x19a   :  { %v416_v53 = vpop.permute.xlu1 %415  ;;  %v508_v6 = vpop.permute.xlu0 %507  ;;  %v542_v30 = vrot.slane %v541_v21, 1 }
 0x19b   :  { %v426_v41 = vadd.f32 %v416_v53, %v403_v10 }
 0x19c   :  { %v543_v36 = vmax.f32 %v541_v21, %v542_v30 }
 0x19d   :  { %v432_v48 = vsel %vm431_vm6, %v426_v41, -inf }
 0x19e   :  { %v464_v42 = vpop.permute.xlu1 %463  ;;  %v414_v43 = vpop.permute.xlu0 %413 }
 0x19f   :  { %v473_v45 = vadd.f32 %v464_v42, %v1000_v24  ;;  %v425_v46 = vadd.f32 %v414_v43, %v402_v40  ;;  %v582_v40 = vld [vmem:[#allocation7] sm:$0xff] }
 0x1a1   :  { %v495_v49 = vadd.f32 %v486_v59, %v473_v45  ;;  %v430_v50 = vsel %vm429_vm5, %v425_v46, -inf }
 0x1a2   :  { %v433_v32 = vmax.f32 %v430_v50, %v432_v48  ;;  %v375_v51 = vpop.permute.xlu1 %374  ;;  %v373_v52 = vpop.permute.xlu0 %372 }
 0x1a3   :  { %v517_v55 = vadd.f32 %v508_v6, %v495_v49  ;;  %v383_v2 = vadd.f32 %v375_v51, %v1005_v27  ;;  %v382_v4 = vadd.f32 %v373_v52, %v993_v20  ;;  %v584_v6 = vld [vmem:[#allocation7 + $0x10] sm:$0xff] }
 0x1a4   :  { %v434_v61 = vrot.slane %v433_v32, 4  ;;  %785 = vmatpush3.msra.mxu0 %v584_v6 }
 0x1a5   :  { %v532_v58 = vadd.f32 %v982_v13, %v517_v55  ;;  %786 = vmatprep.subr.mxu0 %v899_v0 }
 0x1a6   :  { %v397_v62 = vpop.permute.xlu1 %396  ;;  %v395_v24 = vpop.permute.xlu0 %394  ;;  %v435_v15 = vmax.f32 %v433_v32, %v434_v61  ;;  %787 = vmatpush3.msra.mxu0 %v583_v37 }
 0x1a7   :  { %v544_v1 = vsel %vm429_vm5, %v532_v58, -inf  ;;  %v405_v8 = vadd.f32 %v397_v62, %v383_v2  ;;  %v404_v60 = vadd.f32 %v395_v24, %v382_v4  ;;  %788 = vmatprep.subr.mxu0 %v899_v0 }
 0x1a8   :  { %v546_v7 = vmax.f32 %v544_v1, %v545_v63  ;;  %v436_v26 = vrot.slane %v435_v15, 2  ;;  %789 = vmatpush3.msra.mxu0 %v582_v40 }
 0x1aa   :  { %v547_v14 = vrot.slane %v546_v7, 4  ;;  %v420_v13 = vpop.permute.xlu1 %419  ;;  %v418_v16 = vpop.permute.xlu0 %417  ;;  %v437_v33 = vmax.f32 %v435_v15, %v436_v26  ;;  %v693_v26 = vld [vmem:[%s1112_s4] ss:$0 sm:$0xff] }
 0x1ab   :  { %v428_v17 = vadd.f32 %v420_v13, %v405_v8  ;;  %v427_v18 = vadd.f32 %v418_v16, %v404_v60 }
 0x1ac   :  { %v548_v22 = vmax.f32 %v546_v7, %v547_v14  ;;  %v438_v39 = vrot.slane %v437_v33, 1 }
 0x1ad   :  { %v441_v23 = vsel %vm431_vm6, %v428_v17, -inf  ;;  %v440_v25 = vsel %vm429_vm5, %v427_v18, -inf  ;;  %v692_v17 = vld [vmem:[%s1110_s2] ss:$0 sm:$0xff]  ;;  %s866_s2 = scalar_lea.vmem %s683_s17, 32 }
 0x1ae   :  { %v442_v9 = vmax.f32 %v440_v25, %v441_v23  ;;  %v549_v28 = vrot.slane %v548_v22, 2  ;;  %v439_v42 = vmax.f32 %v437_v33, %v438_v39  ;;  %v302_v45 = vpop.permute.xlu1 %301  ;;  %v300_v46 = vpop.permute.xlu0 %299  ;;  %p867_p1 = scmp.ne.s32.totalorder %s683_s17, %s866_s2  ;;  %p872_p3 = scmp.lt.s32.totalorder %s866_s2, %s866_s2 }
 0x1af   :  { %v312_v0 = vadd.f32 %v302_v45, %v965_v3  ;;  %v311_v55 = vadd.f32 %v300_v46, %v953_v56 }
 0x1b0   :  { %v443_v29 = vrot.slane %v442_v9, 4  ;;  %v550_v31 = vmax.f32 %v548_v22, %v549_v28  ;;  %p873_p4 = por %p872_p3, %p871_p2 }
 0x1b2   :  { %v444_v59 = vmax.f32 %v442_v9, %v443_v29  ;;  %v551_v34 = vrot.slane %v550_v31, 1  ;;  %v306_v47 = vpop.permute.xlu1 %305  ;;  %v304_v48 = vpop.permute.xlu0 %303  ;;  %p874_p5 = pnand %p873_p4, %p867_p1 }
 0x1b3   :  { %v314_v52 = vadd.f32 %v306_v47, %v1005_v27  ;;  %v313_v54 = vadd.f32 %v304_v48, %v993_v20 }
 0x1b4   :  { %v445_v35 = vrot.slane %v444_v59, 2  ;;  %v552_v53 = vmax.f32 %v550_v31, %v551_v34 }
 0x1b6   :  { %v446_v38 = vmax.f32 %v444_v59, %v445_v35  ;;  %v566_v10 = vsel %vm555_vm7, %v552_v53, %v543_v36  ;;  %v325_v49 = vpop.permute.xlu1 %324  ;;  %v323_v50 = vpop.permute.xlu0 %322 }
 0x1b7   :  { %567 = vrot.lane.b32.xlu1 %v566_v10, %s901_s3  ;;  %v335_v61 = vadd.f32 %v325_v49, %v312_v0  ;;  %v334_v62 = vadd.f32 %v323_v50, %v311_v55 }
 0x1b8   :  { %v447_v41 = vrot.slane %v446_v38, 1 }
 0x1b9   :  { %v341_v1 = vsel %vm340_vm9, %v335_v61, -inf  ;;  %v339_v2 = vsel %vm338_vm10, %v334_v62, -inf }
 0x1ba   :  { %v448_v43 = vmax.f32 %v446_v38, %v447_v41  ;;  %v329_v32 = vpop.permute.xlu1 %328  ;;  %v327_v51 = vpop.permute.xlu0 %326  ;;  %v342_v27 = vmax.f32 %v339_v2, %v341_v1 }
 0x1bb   :  { %v337_v57 = vadd.f32 %v329_v32, %v314_v52  ;;  %v336_v58 = vadd.f32 %v327_v51, %v313_v54 }
 0x1bc   :  { %v560_v44 = vsel %vm555_vm7, %v448_v43, %v439_v42  ;;  %v343_v20 = vrot.slane %v342_v27, 4 }
 0x1bd   :  { %561 = vrot.lane.b32.xlu0 %v560_v44, %s900_s0  ;;  %v350_v24 = vsel %vm340_vm9, %v337_v57, -inf  ;;  %v349_v63 = vsel %vm338_vm10, %v336_v58, -inf }
 0x1be   :  { %v351_v4 = vmax.f32 %v349_v63, %v350_v24  ;;  %v344_v3 = vmax.f32 %v342_v27, %v343_v20 }
 0x1c0   :  { %v352_v5 = vrot.slane %v351_v4, 4  ;;  %v345_v56 = vrot.slane %v344_v3, 2 }
 0x1c2   :  { %v353_v7 = vmax.f32 %v351_v4, %v352_v5  ;;  %v346_v11 = vmax.f32 %v344_v3, %v345_v56 }
 0x1c4   :  { %v354_v8 = vrot.slane %v353_v7, 2  ;;  %v347_v14 = vrot.slane %v346_v11, 1 }
 0x1c6   :  { %v355_v60 = vmax.f32 %v353_v7, %v354_v8  ;;  %v348_v13 = vmax.f32 %v346_v11, %v347_v14 }
 0x1c8   :  { %v356_v12 = vrot.slane %v355_v60, 1 }
 0x1ca   :  { %v357_v15 = vmax.f32 %v355_v60, %v356_v12 }
 0x1cc   :  { %v556_v16 = vsel %vm555_vm7, %v357_v15, %v348_v13 }
 0x229   :  { %v568_v19 = vpop.permute.xlu1 %567 }
 0x22f   :  { %v562_v18 = vpop.permute.xlu0 %561 }
 0x230   :  { %v570_v21 = vsel %vm338_vm10, %v556_v16, %v562_v18 }
 0x231   :  { %v572_v22 = vsel %vm571_vm11, %v570_v21, %v568_v19 }
 0x232   :  { %v580_v23 = vadd.f32 %v692_v17, %v572_v22 }
 0x234   :  { %v581_v25 = vmax.f32 %v580_v23, 0.0 }
 0x236   :  { %791 = vmatmul.mubr.msk.f32.vlgmr.msra.gmra.mxu0 %vm601_vm12, %v581_v25 }
 0x2f6   :  { %v671_v9 = vpop.f32.mrf.mxu0 }
 0x2f7   :  { %v672_v28 = vadd.f32 %v693_v26, %v671_v9 }
 0x2f8   :  { %v792_v29 = vpop.f32.mrf.mxu0 }
 0x2f9   :  { %675 = vst [vmem:[#allocation8] sm:$0x3] %v672_v28 }
 0x2fa   :  { %877 = shalt.err (!%p874_p5)
}
 0x2fb   :  { %685 = dma.vmem_to_hbm [thread:$0]  %s683_s17, 32, %s1113_s5, [#allocation4]  }
 0x2fc   :  { %890 = dma.done.wait [#allocation4], 32  }
 0x2fd   :  { %891 = vsyncadd [#allocation4], 4294967264 }
 0x2fe   :  { %689 = vsyncpa [#allocation3], 1 }
 0x2ff   :  { %690 = vsyncpa [#allocation6], 1 }
 0x300   :  { %691 = vsyncpa [#allocation4], 1 }

</bundles_post_ra>
